<compile_context>
chip_gen: v6e
topology: v6e:2x2x1
jax: 0.10.0
libtpu: 0.0.40
codegen_flags: <defaults>
</compile_context>

<pallas_src>
import jax
import jax.numpy as jnp
from jax.experimental import pallas as pl
from jax.experimental.pallas import tpu as pltpu


def _mlp_kernel(xt_ref, w0_ref, b0_ref, w1_ref, b1_ref, w2_ref, b2_ref, o_ref):
    # dense0 + ReLU:  h0^T = w0 @ x^T + b0            -> (H1, Bt)
    h0 = jnp.dot(w0_ref[...], xt_ref[...], preferred_element_type=jnp.float32)
    h0 = jnp.maximum(h0 + b0_ref[...], 0.0)            # b0 is (H1,1): lane broadcast
    # dense1 + ReLU:  h1^T = w1 @ h0^T + b1           -> (H2, Bt)
    h1 = jnp.dot(w1_ref[...], h0, preferred_element_type=jnp.float32)
    h1 = jnp.maximum(h1 + b1_ref[...], 0.0)
    # Output layer (K=H2=10, M=1): VPU multiply + sublane (XLU) reduce instead
    # of a <10%-utilized MXU pass.  Result is a lane-dense (1, Bt) row.
    y = jnp.sum(h1 * w2_ref[...], axis=0, keepdims=True) + b2_ref[...]
    o_ref[...] = y.astype(o_ref.dtype)


def _round_up(n, m):
    return ((n + m - 1) // m) * m


# ~8 MiB/step at f32: fits every generation's default scoped-VMEM limit with
# headroom.  Sweep 4096-32768 on v6e/v7x via the batch_tile argument.
_DEFAULT_TILE_CAP = 16384


def _choose_batch_tile(B):
    """Biggest lane-dense tile (multiple of 128) that is safe everywhere.
    No forced multi-step split: single-TC chips prefer one big step."""
    return min(_round_up(max(B, 1), 128), _DEFAULT_TILE_CAP)


def regressor_module2_forward_t(xt, params, *, batch_tile=None):
    """Fast path: x already in feature-major (F, B) layout.  Returns (1, B).

    The kernel reads xt straight from HBM exactly once -- no wrapper-side
    transpose/pad passes over the dominant x stream.
    """
    w0, b0 = params["w0"], params["b0"]
    w1, b1 = params["w1"], params["b1"]
    w2, b2 = params["w2"], params["b2"]

    F, B = xt.shape
    H1 = w0.shape[0]
    H2 = w1.shape[0]

    if batch_tile is None:
        batch_tile = _choose_batch_tile(B)
    if batch_tile <= 0 or batch_tile % 128 != 0:
        raise ValueError("batch_tile must be a positive multiple of 128 "
                         "(lane-dense blocks require it)")

    # Unpadded grid: Pallas masks the partial tail block (padded input columns
    # compute garbage that is never written back).
    grid = (pl.cdiv(B, batch_tile),)

    # Keep matmul operand dtypes matched (bf16 x-stream stays bf16 on the MXU;
    # accumulation is f32 via preferred_element_type).
    w0_in = w0 if xt.dtype == jnp.dtype(jnp.float32) else w0.astype(xt.dtype)

    b0c = b0.reshape(H1, 1).astype(jnp.float32)
    b1c = b1.reshape(H2, 1).astype(jnp.float32)
    w2c = w2.reshape(H2, 1).astype(jnp.float32)    # output weight as a column
    b2c = b2.reshape(1, 1).astype(jnp.float32)

    x_itemsize = jnp.dtype(xt.dtype).itemsize
    flops = 2 * B * (F * H1 + H1 * H2 + H2)
    bytes_accessed = (
        xt.size * x_itemsize
        + w0_in.size * jnp.dtype(w0_in.dtype).itemsize
        + (b0c.size + w1.size + b1c.size + w2c.size + b2c.size) * 4
        + B * 4                                     # (1, B) f32 output
    )

    # Per-step VMEM estimate: double-buffered x/out blocks + f32 h0/h1 temps.
    pad8 = lambda n: _round_up(n, 8)
    vmem_est = (2 * pad8(F) * batch_tile * x_itemsize
                + (pad8(H1) + pad8(H2)) * batch_tile * 4
                + 2 * 8 * batch_tile * 4)
    compiler_kwargs = dict(dimension_semantics=("parallel",))
    if vmem_est > (14 << 20):
        # Only override the scoped-VMEM default when a caller-supplied tile
        # actually needs it; stay well under v7x's 64 MiB physical VMEM.
        compiler_kwargs["vmem_limit_bytes"] = int(min(vmem_est + (8 << 20), 48 << 20))

    # TODO(synk): if a bundle dump still shows exposed DMA waits on the x
    # stream at large tiles, add pipeline_mode=pl.Buffered(3) to the x spec.
    out = pl.pallas_call(
        _mlp_kernel,
        out_shape=jax.ShapeDtypeStruct((1, B), jnp.float32),
        grid_spec=pl.GridSpec(
            grid=grid,
            in_specs=[
                pl.BlockSpec((F, batch_tile), lambda i: (0, i)),   # x^T tile (batch on lanes)
                pl.BlockSpec((H1, F), lambda i: (0, 0)),           # w0 (resident)
                pl.BlockSpec((H1, 1), lambda i: (0, 0)),           # b0
                pl.BlockSpec((H2, H1), lambda i: (0, 0)),          # w1
                pl.BlockSpec((H2, 1), lambda i: (0, 0)),           # b1
                pl.BlockSpec((H2, 1), lambda i: (0, 0)),           # w2 column
                pl.BlockSpec((1, 1), lambda i: (0, 0)),            # b2
            ],
            out_specs=pl.BlockSpec((1, batch_tile), lambda i: (0, i)),  # lane-dense row
        ),
        compiler_params=pltpu.CompilerParams(**compiler_kwargs),
        cost_estimate=pl.CostEstimate(
            flops=flops, transcendentals=0, bytes_accessed=bytes_accessed),
    )(xt, w0_in, b0c, w1, b1c, w2c, b2c)

    return out


def regressor_module2_forward(x, params, *, batch_tile=None, use_bf16_inputs=False):
    """PyTorch-layout entry point.

    x:       (B, n_feature) float32
    params:  PyTorch-layout weights:
             w0 (H1, F), b0 (H1,), w1 (H2, H1), b1 (H2,), w2 (1, H2), b2 (1,)
    Returns (B, 1) float32.
    """
    B, _ = x.shape
    dt = jnp.bfloat16 if use_bf16_inputs else jnp.float32
    # Single fused cast+transpose copy of x.  Upstream callers that can
    # produce feature-major (F, B) data should call
    # regressor_module2_forward_t directly and skip even this copy.
    xt = x.astype(dt).T
    out = regressor_module2_forward_t(xt, params, batch_tile=batch_tile)
    # (1, B) -> (B, 1) is a pure reshape (same flat order): no transpose copy.
    return out.reshape(B, 1)


def init_params(key, n_feature=10, num_units=10):
    """Deterministic init matching PyTorch nn.Linear defaults
    (U(-1/sqrt(fan_in), 1/sqrt(fan_in))). Stored in PyTorch (out, in) layout."""
    h1 = num_units * 5
    h2 = num_units
    ks = jax.random.split(key, 6)

    def unif(k, shape, fan_in):
        bound = float(fan_in) ** -0.5
        return jax.random.uniform(k, shape, jnp.float32, -bound, bound)

    return {
        "w0": unif(ks[0], (h1, n_feature), n_feature),
        "b0": unif(ks[1], (h1,), n_feature),
        "w1": unif(ks[2], (h2, h1), h1),
        "b1": unif(ks[3], (h2,), h1),
        "w2": unif(ks[4], (1, h2), h2),
        "b2": unif(ks[5], (1,), h2),
    }


def _reference_forward(x, p):
    h0 = jnp.maximum(x @ p["w0"].T + p["b0"], 0.0)
    h1 = jnp.maximum(h0 @ p["w1"].T + p["b1"], 0.0)
    return h1 @ p["w2"].T + p["b2"]


if __name__ == "__main__":
    key = jax.random.PRNGKey(0)
    k_params, k_x_small, k_x_tail, k_x_big = jax.random.split(key, 4)

    n_feature, num_units = 10, 10
    params = init_params(k_params, n_feature=n_feature, num_units=num_units)

    # Small batch at the module's default widths (standardized RNA matrix rows).
    x_small = jax.random.normal(k_x_small, (8, n_feature), dtype=jnp.float32)
    y_small = jax.block_until_ready(regressor_module2_forward(x_small, params))
    assert y_small.shape == (8, 1)
    assert jnp.allclose(y_small, _reference_forward(x_small, params),
                        atol=1e-4, rtol=1e-4)

    # Batch that is NOT a multiple of 128: exercises the masked tail block of
    # the unpadded pl.cdiv grid (review's correctness concern).
    x_tail = jax.random.normal(k_x_tail, (1000, n_feature), dtype=jnp.float32)
    y_tail = jax.block_until_ready(regressor_module2_forward(x_tail, params))
    assert y_tail.shape == (1000, 1)
    assert jnp.allclose(y_tail, _reference_forward(x_tail, params),
                        atol=1e-4, rtol=1e-4)

    # Multi-step pipelined grid (explicit small tile) + the feature-major fast path.
    x_big = jax.random.normal(k_x_big, (1024, n_feature), dtype=jnp.float32)
    y_big_ref = _reference_forward(x_big, params)
    y_big = jax.block_until_ready(
        regressor_module2_forward(x_big, params, batch_tile=512))
    assert y_big.shape == (1024, 1)
    assert jnp.allclose(y_big, y_big_ref, atol=1e-4, rtol=1e-4)

    yt = jax.block_until_ready(regressor_module2_forward_t(x_big.T, params))
    assert yt.shape == (1, 1024)
    assert jnp.allclose(yt.reshape(1024, 1), y_big_ref, atol=1e-4, rtol=1e-4)

    # Opt-in bf16 x-stream (cast fuses into the transpose copy; f32 accumulation).
    y_bf16 = jax.block_until_ready(
        regressor_module2_forward(x_big, params, use_bf16_inputs=True))
    assert float(jnp.max(jnp.abs(y_bf16 - y_big_ref))) < 0.1

    print("KERNEL_OK")
</pallas_src>

<mosaic_0001>
module attributes {stable_mosaic.version = 11 : i64} {
  func.func @_mlp_kernel(%arg0: i32, %arg1: memref<10x128xf32, #tpu.memory_space<vmem>>, %arg2: memref<50x10xf32, #tpu.memory_space<vmem>>, %arg3: memref<50x1xf32, #tpu.memory_space<vmem>>, %arg4: memref<10x50xf32, #tpu.memory_space<vmem>>, %arg5: memref<10x1xf32, #tpu.memory_space<vmem>>, %arg6: memref<10x1xf32, #tpu.memory_space<vmem>>, %arg7: memref<1x1xf32, #tpu.memory_space<vmem>>, %arg8: memref<1x128xf32, #tpu.memory_space<vmem>>) attributes {dimension_semantics = [#tpu.dimension_semantics<parallel>], iteration_bounds = array<i64: 1>, scalar_prefetch = 0 : i64, scratch_operands = 0 : i64, tpu.core_type = #tpu.core_type<tc>, window_params = [{transform_indices = @transform_0, window_bounds = array<i64: 10, 128>}, {pipeline_mode = #tpu.pipeline_mode<synchronous>, transform_indices = @transform_1, window_bounds = array<i64: 50, 10>}, {pipeline_mode = #tpu.pipeline_mode<synchronous>, transform_indices = @transform_2, window_bounds = array<i64: 50, 1>}, {pipeline_mode = #tpu.pipeline_mode<synchronous>, transform_indices = @transform_3, window_bounds = array<i64: 10, 50>}, {pipeline_mode = #tpu.pipeline_mode<synchronous>, transform_indices = @transform_4, window_bounds = array<i64: 10, 1>}, {pipeline_mode = #tpu.pipeline_mode<synchronous>, transform_indices = @transform_5, window_bounds = array<i64: 10, 1>}, {pipeline_mode = #tpu.pipeline_mode<synchronous>, transform_indices = @transform_6, window_bounds = array<i64: 1, 1>}, {transform_indices = @transform_7, window_bounds = array<i64: 1, 128>}]} {
    %c0 = arith.constant 0 : index
    %c0_0 = arith.constant 0 : index
    %0 = vector.load %arg2[%c0, %c0_0] : memref<50x10xf32, #tpu.memory_space<vmem>>, vector<50x10xf32>
    %c0_1 = arith.constant 0 : index
    %c0_2 = arith.constant 0 : index
    %1 = vector.load %arg1[%c0_1, %c0_2] : memref<10x128xf32, #tpu.memory_space<vmem>>, vector<10x128xf32>
    %cst = arith.constant dense<0.000000e+00> : vector<50x128xf32>
    %2 = tpu.matmul %0, %1, %cst {dimension_numbers = #tpu.dot_dimension_numbers<[1], [0], [0], [1], [0, 0, 1, 1], [], []>} : vector<50x10xf32>, vector<10x128xf32>, vector<50x128xf32> -> vector<50x128xf32>
    %c0_3 = arith.constant 0 : index
    %c0_4 = arith.constant 0 : index
    %3 = vector.load %arg3[%c0_3, %c0_4] : memref<50x1xf32, #tpu.memory_space<vmem>>, vector<50x1xf32>
    %4 = vector.broadcast %3 : vector<50x1xf32> to vector<50x128xf32>
    %5 = arith.addf %2, %4 : vector<50x128xf32>
    %cst_5 = arith.constant 0.000000e+00 : f32
    %6 = vector.broadcast %cst_5 : f32 to vector<50x128xf32>
    %7 = arith.maximumf %5, %6 : vector<50x128xf32>
    %c0_6 = arith.constant 0 : index
    %c0_7 = arith.constant 0 : index
    %8 = vector.load %arg4[%c0_6, %c0_7] : memref<10x50xf32, #tpu.memory_space<vmem>>, vector<10x50xf32>
    %cst_8 = arith.constant dense<0.000000e+00> : vector<10x128xf32>
    %9 = tpu.matmul %8, %7, %cst_8 {dimension_numbers = #tpu.dot_dimension_numbers<[1], [0], [0], [1], [0, 0, 1, 1], [], []>} : vector<10x50xf32>, vector<50x128xf32>, vector<10x128xf32> -> vector<10x128xf32>
    %c0_9 = arith.constant 0 : index
    %c0_10 = arith.constant 0 : index
    %10 = vector.load %arg5[%c0_9, %c0_10] : memref<10x1xf32, #tpu.memory_space<vmem>>, vector<10x1xf32>
    %11 = vector.broadcast %10 : vector<10x1xf32> to vector<10x128xf32>
    %12 = arith.addf %9, %11 : vector<10x128xf32>
    %cst_11 = arith.constant 0.000000e+00 : f32
    %13 = vector.broadcast %cst_11 : f32 to vector<10x128xf32>
    %14 = arith.maximumf %12, %13 : vector<10x128xf32>
    %c0_12 = arith.constant 0 : index
    %c0_13 = arith.constant 0 : index
    %15 = vector.load %arg6[%c0_12, %c0_13] : memref<10x1xf32, #tpu.memory_space<vmem>>, vector<10x1xf32>
    %16 = vector.broadcast %15 : vector<10x1xf32> to vector<10x128xf32>
    %17 = arith.mulf %14, %16 : vector<10x128xf32>
    %cst_14 = arith.constant dense<0.000000e+00> : vector<128xf32>
    %18 = vector.multi_reduction <add>, %17, %cst_14 [0] : vector<10x128xf32> to vector<128xf32>
    %19 = vector.shape_cast %18 : vector<128xf32> to vector<1x128xf32>
    %c0_15 = arith.constant 0 : index
    %c0_16 = arith.constant 0 : index
    %20 = vector.load %arg7[%c0_15, %c0_16] : memref<1x1xf32, #tpu.memory_space<vmem>>, vector<1x1xf32>
    %21 = vector.broadcast %20 : vector<1x1xf32> to vector<1x128xf32>
    %22 = arith.addf %19, %21 : vector<1x128xf32>
    %c0_17 = arith.constant 0 : index
    %c0_18 = arith.constant 0 : index
    %23 = vector.load %arg8[%c0_17, %c0_18] : memref<1x128xf32, #tpu.memory_space<vmem>>, vector<1x128xf32>
    tpu.vector_store %arg8[%c0_17, %c0_18], %22 {strides = array<i32>} : memref<1x128xf32, #tpu.memory_space<vmem>>, vector<1x128xf32>,
    return
  }
  func.func @transform_0(%arg0: i32) -> (i32, i32) {
    %c0_i32 = arith.constant 0 : i32
    %c0_i32_0 = arith.constant 0 : i32
    return %c0_i32, %arg0 : i32, i32
  }
  func.func @transform_1(%arg0: i32) -> (i32, i32) {
    %c0_i32 = arith.constant 0 : i32
    %c0_i32_0 = arith.constant 0 : i32
    %c0_i32_1 = arith.constant 0 : i32
    return %c0_i32, %c0_i32_0 : i32, i32
  }
  func.func @transform_2(%arg0: i32) -> (i32, i32) {
    %c0_i32 = arith.constant 0 : i32
    %c0_i32_0 = arith.constant 0 : i32
    %c0_i32_1 = arith.constant 0 : i32
    return %c0_i32, %c0_i32_0 : i32, i32
  }
  func.func @transform_3(%arg0: i32) -> (i32, i32) {
    %c0_i32 = arith.constant 0 : i32
    %c0_i32_0 = arith.constant 0 : i32
    %c0_i32_1 = arith.constant 0 : i32
    return %c0_i32, %c0_i32_0 : i32, i32
  }
  func.func @transform_4(%arg0: i32) -> (i32, i32) {
    %c0_i32 = arith.constant 0 : i32
    %c0_i32_0 = arith.constant 0 : i32
    %c0_i32_1 = arith.constant 0 : i32
    return %c0_i32, %c0_i32_0 : i32, i32
  }
  func.func @transform_5(%arg0: i32) -> (i32, i32) {
    %c0_i32 = arith.constant 0 : i32
    %c0_i32_0 = arith.constant 0 : i32
    %c0_i32_1 = arith.constant 0 : i32
    return %c0_i32, %c0_i32_0 : i32, i32
  }
  func.func @transform_6(%arg0: i32) -> (i32, i32) {
    %c0_i32 = arith.constant 0 : i32
    %c0_i32_0 = arith.constant 0 : i32
    %c0_i32_1 = arith.constant 0 : i32
    return %c0_i32, %c0_i32_0 : i32, i32
  }
  func.func @transform_7(%arg0: i32) -> (i32, i32) {
    %c0_i32 = arith.constant 0 : i32
    %c0_i32_0 = arith.constant 0 : i32
    return %c0_i32, %arg0 : i32, i32
  }
}

</mosaic_0001>

<bundles_post_ra>
// kernel: tpu_custom_call.1
= control target key start
LH: loop header
LB: loop body
LE: loop exit
PB: predicated region body
PF: predicated region fallthrough
CT: control target
= control target key end

     0   :  { %s597_s0 = inlined_call_operand.vmem [shape: f32[10,8], index: 0, kind: input, shape index: {}]   ;;  %s598_s1 = inlined_call_operand.vmem [shape: f32[50,10], index: 1, kind: input, shape index: {}]   ;;  %s599_s2 = inlined_call_operand.vmem [shape: f32[50,1], index: 2, kind: input, shape index: {}]   ;;  %s600_s3 = inlined_call_operand.vmem [shape: f32[10,50], index: 3, kind: input, shape index: {}]   ;;  %s601_s4 = inlined_call_operand.vmem [shape: f32[10,1], index: 4, kind: input, shape index: {}]   ;;  %s602_s5 = inlined_call_operand.vmem [shape: f32[10,1], index: 5, kind: input, shape index: {}]   ;;  %s603_s6 = inlined_call_operand.<no memory space> [shape: f32[1,1], index: 6, kind: input, shape index: {}]   ;;  %s604_s7 = inlined_call_operand.hbm [shape: f32[1,8], index: 7, kind: output, shape index: {}]  }
   0x1   :  { %v12_v0 = vstv %s603_s6 }
   0x2   :  { %13 = vst [vmem:[#allocation2] sm:$0x1] %v12_v0 }
   0x3   :  { %v37_v1 = vld [vmem:[%s597_s0 + $0x8] sm:$0x3]  ;;  %vm102_vm0 = vcmask 1041408   ;;  %v461_v2 = vmov 0.0   ;;  %v36_v3 = vld [vmem:[%s597_s0] sm:$0xff]  ;;  %vm462_vm1 = vmmov 0  }
   0x4   :  { %391 = vmatprep.subr.mxu0 %v461_v2  ;;  %395 = vmatprep.mubr.msk.f32.mxu0 %vm462_vm1, %v461_v2  ;;  %v29_v4 = vld [vmem:[%s598_s1] sm:$0xff]  ;;  %vm80_vm2 = vcmask 80896   ;;  %v463_v5 = vmov 0   ;;  %v44_v6 = vld [vmem:[%s599_s2 + $0x30] sm:$0x3]  ;;  %v43_v8 = vld [vmem:[%s599_s2 + $0x28] sm:$0xff] }
   0x5   :  { %392 = vmatpush3.msk.msra.mxu0 %vm102_vm0, %v37_v1  ;;  %437 = vset.pattern.permute.xlu0 %v463_v5  ;;  %v42_v7 = vld [vmem:[%s599_s2 + $0x20] sm:$0xff]  ;;  %v30_v9 = vld [vmem:[%s598_s1 + $0x8] sm:$0xff]  ;;  %v41_v10 = vld [vmem:[%s599_s2 + $0x18] sm:$0xff] }
   0x6   :  { %393 = vmatprep.subr.mxu0 %v461_v2  ;;  %438 = vset.pattern.permute.xlu1 %v463_v5 }
   0x7   :  { %394 = vmatpush3.msra.mxu0 %v36_v3  ;;  %77 = vperm.xlu0 %437, %v44_v6  }
   0x8   :  { %396 = vmatmul.mubr.msk.f32.vlgmr.msra.gmra.mxu0 %vm80_vm2, %v29_v4  ;;  %67 = vperm.xlu1 %438, %v42_v7  }
   0x9   :  { %398 = vmatprep.mubr.msk.f32.mxu0 %vm462_vm1, %v461_v2 }
   0xa   :  { %14 = vsyncpa [#allocation4], 0  ;;  %v40_v11 = vld [vmem:[%s599_s2 + $0x10] sm:$0xff]  ;;  %v39_v13 = vld [vmem:[%s599_s2 + $0x8] sm:$0xff]  ;;  %vm227_vm3 = vcmask 408576  }
   0xb   :  { %72 = vperm.xlu0 %437, %v43_v8   ;;  %v31_v12 = vld [vmem:[%s598_s1 + $0x10] sm:$0xff]  ;;  %v38_v14 = vld [vmem:[%s599_s2] sm:$0xff]  ;;  %v32_v15 = vld [vmem:[%s598_s1 + $0x18] sm:$0xff] }
   0xc   :  { %399 = vmatmul.mubr.msk.f32.gmra.mxu0 %vm80_vm2, %v30_v9  ;;  %62 = vperm.xlu1 %438, %v41_v10   ;;  %v216_v16 = vld [vmem:[%s601_s4 + $0x8] sm:$0x3]  ;;  %v215_v17 = vld [vmem:[%s601_s4] sm:$0xff]  ;;  %v35_v23 = vld [vmem:[%s598_s1 + $0x30] sm:$0x3]  ;;  %v342_v10 = vlaneseq }
   0xd   :  { %401 = vmatprep.mubr.msk.f32.mxu0 %vm462_vm1, %v461_v2  ;;  %v33_v18 = vld [vmem:[%s598_s1 + $0x20] sm:$0xff]  ;;  %v315_v19 = vld [vmem:[%s602_s5 + $0x8] sm:$0x3] }
   0xe   :  { %v314_v20 = vld [vmem:[%s602_s5] sm:$0xff]  ;;  %v34_v21 = vld [vmem:[%s598_s1 + $0x28] sm:$0xff] }
   0xf   :  { %57 = vperm.xlu0 %437, %v40_v11   ;;  %v336_v22 = vld [vmem:[#allocation2] sm:$0x1]  ;;  %v214_v60 = vld [vmem:[%s600_s3 + $0x8] sm:$0x3] }
  0x10   :  { %402 = vmatmul.mubr.msk.f32.gmra.mxu0 %vm80_vm2, %v31_v12  ;;  %52 = vperm.xlu1 %438, %v39_v13   ;;  %v213_v24 = vld [vmem:[%s600_s3] sm:$0xff]  ;;  %v343_v13 = vshrl.u32 %v342_v10, 7  ;;  %s464_s3 = smov [#allocation3]  }
  0x11   :  { %404 = vmatprep.mubr.msk.f32.mxu0 %vm462_vm1, %v461_v2  ;;  %430 = vmatprep.mubr.msk.f32.mxu1 %vm227_vm3, %v213_v24  ;;  %s354_s16 = sshll.u32 %s464_s3, 4  ;;  %s355_s16 = int_to_ptr.vmem [resolvable:$true] %s354_s16 }
  0x12   :  { %s439_s17 = scalar_lea.vmem %s355_s16, 16  ;;  %s443_s18 = scalar_lea.vmem %s355_s16, 32 }
  0x13   :  { %47 = vperm.xlu0 %437, %v38_v14   ;;  %p440_p0 = scmp.ne.s32.totalorder %s355_s16, %s439_s17  ;;  %p444_p1 = scmp.lt.s32.totalorder %s355_s16, %s355_s16 }
  0x14   :  { %405 = vmatmul.mubr.msk.f32.gmra.mxu0 %vm80_vm2, %v32_v15  ;;  %224 = vperm.xlu1 %438, %v216_v16   ;;  %v344_v16 = vsub.s32 0, %v343_v13  ;;  %p445_p2 = scmp.lt.s32.totalorder %s443_s18, %s439_s17 }
  0x15   :  { %407 = vmatprep.mubr.msk.f32.mxu0 %vm462_vm1, %v461_v2 }
  0x16   :  { %p446_p3 = por %p445_p2, %p444_p1 }
  0x17   :  { %219 = vperm.xlu0 %437, %v215_v17  }
  0x18   :  { %408 = vmatmul.mubr.msk.f32.gmra.mxu0 %vm80_vm2, %v33_v18  ;;  %323 = vperm.xlu1 %438, %v315_v19   ;;  %p447_p4 = pnand %p446_p3, %p440_p0 }
  0x19   :  { %410 = vmatprep.mubr.msk.f32.mxu0 %vm462_vm1, %v461_v2 }
  0x1b   :  { %318 = vperm.xlu0 %437, %v314_v20  }
  0x1c   :  { %411 = vmatmul.mubr.msk.f32.gmra.mxu0 %vm80_vm2, %v34_v21  ;;  %339 = vperm.xlu1 %438, %v336_v22  }
  0x1d   :  { %413 = vmatprep.mubr.msk.f32.mxu0 %vm462_vm1, %v461_v2 }
  0x20   :  { %414 = vmatmul.mubr.msk.f32.gmra.mxu0 %vm80_vm2, %v35_v23 }
  0x82   :  { %v78_v32 = vpop.permute.xlu0 %77 }
  0x83   :  { %v68_v35 = vpop.permute.xlu1 %67 }
  0x86   :  { %v73_v37 = vpop.permute.xlu0 %72 }
  0x87   :  { %v63_v40 = vpop.permute.xlu1 %62 }
  0x8a   :  { %v58_v44 = vpop.permute.xlu0 %57 }
  0x8b   :  { %v53_v50 = vpop.permute.xlu1 %52 }
  0x8e   :  { %v48_v53 = vpop.permute.xlu0 %47 }
  0x8f   :  { %v225_v61 = vpop.permute.xlu1 %224 }
  0x92   :  { %v220_v62 = vpop.permute.xlu0 %219 }
  0x93   :  { %v324_v4 = vpop.permute.xlu1 %323 }
  0x96   :  { %v319_v7 = vpop.permute.xlu0 %318 }
  0x97   :  { %v340_v18 = vpop.permute.xlu1 %339 }
  0x98   :  { %v345_v20 = vrot.slane %v340_v18, %v344_v16 }
  0xc8   :  { %v172_v25 = vpop.f32.mrf.mxu0 }
  0xc9   :  { %v173_v56 = vadd.f32 %v172_v25, %v48_v53 }
  0xca   :  { %v397_v26 = vpop.f32.mrf.mxu0 }
  0xcb   :  { %v206_v59 = vmax.f32 %v173_v56, 0.0 }
  0xcc   :  { %v177_v27 = vpop.f32.mrf.mxu0 }
  0xcd   :  { %v178_v54 = vadd.f32 %v177_v27, %v53_v50 }
  0xce   :  { %v400_v28 = vpop.f32.mrf.mxu0 }
  0xcf   :  { %v207_v58 = vmax.f32 %v178_v54, 0.0 }
  0xd0   :  { %v182_v29 = vpop.f32.mrf.mxu0 }
  0xd1   :  { %v183_v51 = vadd.f32 %v182_v29, %v58_v44 }
  0xd2   :  { %v403_v30 = vpop.f32.mrf.mxu0 }
  0xd3   :  { %v208_v57 = vmax.f32 %v183_v51, 0.0 }
  0xd4   :  { %v187_v31 = vpop.f32.mrf.mxu0 }
  0xd5   :  { %v188_v48 = vadd.f32 %v187_v31, %v63_v40 }
  0xd6   :  { %v406_v33 = vpop.f32.mrf.mxu0 }
  0xd7   :  { %v209_v55 = vmax.f32 %v188_v48, 0.0 }
  0xd8   :  { %v192_v34 = vpop.f32.mrf.mxu0 }
  0xd9   :  { %v193_v46 = vadd.f32 %v192_v34, %v68_v35 }
  0xda   :  { %v409_v36 = vpop.f32.mrf.mxu0 }
  0xdb   :  { %v210_v52 = vmax.f32 %v193_v46, 0.0 }
  0xdc   :  { %v197_v38 = vpop.f32.mrf.mxu0 }
  0xdd   :  { %v198_v42 = vadd.f32 %v197_v38, %v73_v37 }
  0xde   :  { %v412_v39 = vpop.f32.mrf.mxu0 }
  0xdf   :  { %v211_v49 = vmax.f32 %v198_v42, 0.0 }
  0xe0   :  { %v202_v41 = vpop.f32.mrf.mxu0 }
  0xe1   :  { %v203_v43 = vadd.f32 %v202_v41, %v78_v32 }
  0xe2   :  { %v415_v45 = vpop.f32.mrf.mxu0 }
  0xe3   :  { %v212_v47 = vmax.f32 %v203_v43, 0.0 }
  0xe5   :  { %416 = vmatprep.subr.msk.mxu1 %vm102_vm0, %v212_v47 }
  0xe6   :  { %417 = vmatpush3.msk.msra.mxu1 %vm102_vm0, %v212_v47 }
  0xe7   :  { %418 = vmatprep.subr.mxu1 %v211_v49 }
  0xe8   :  { %419 = vmatpush3.msra.mxu1 %v211_v49 }
  0xe9   :  { %420 = vmatprep.subr.mxu1 %v210_v52 }
  0xea   :  { %421 = vmatpush3.msra.mxu1 %v210_v52 }
  0xeb   :  { %422 = vmatprep.subr.mxu1 %v209_v55 }
  0xec   :  { %423 = vmatpush3.msra.mxu1 %v209_v55 }
  0xed   :  { %424 = vmatprep.subr.mxu1 %v208_v57 }
  0xee   :  { %425 = vmatpush3.msra.mxu1 %v208_v57 }
  0xef   :  { %426 = vmatprep.subr.mxu1 %v207_v58 }
  0xf0   :  { %427 = vmatpush3.msra.mxu1 %v207_v58 }
  0xf1   :  { %428 = vmatprep.subr.mxu1 %v206_v59 }
  0xf2   :  { %429 = vmatpush3.msra.mxu1 %v206_v59 }
  0xf3   :  { %431 = vmatmul.mubr.msk.f32.vlgmr.msra.gmra.mxu1 %vm227_vm3, %v214_v60 }
 0x1b3   :  { %v432_v63 = vpop.f32.mrf.mxu1 }
 0x1b4   :  { %v309_v0 = vadd.f32 %v432_v63, %v225_v61 }
 0x1b5   :  { %v303_v1 = vpop.f32.mrf.mxu1 }
 0x1b6   :  { %v313_v2 = vmax.f32 %v309_v0, 0.0  ;;  %v304_v3 = vadd.f32 %v303_v1, %v220_v62 }
 0x1b8   :  { %v327_v5 = vmul.f32 %v324_v4, %v313_v2  ;;  %v312_v6 = vmax.f32 %v304_v3, 0.0 }
 0x1ba   :  { %v328_v8 = vsel %vm102_vm0, %v327_v5, 0.0  ;;  %v326_v9 = vmul.f32 %v319_v7, %v312_v6 }
 0x1bc   :  { %v329_v11 = vadd.f32 %v328_v8, %v326_v9 }
 0x1be   :  { %v330_v12 = vrot.slane %v329_v11, 4 }
 0x1c0   :  { %v331_v14 = vadd.f32 %v330_v12, %v329_v11 }
 0x1c2   :  { %v332_v15 = vrot.slane %v331_v14, 2 }
 0x1c4   :  { %v333_v17 = vadd.f32 %v332_v15, %v331_v14 }
 0x1c6   :  { %v334_v19 = vrot.slane %v333_v17, 1 }
 0x1c8   :  { %v335_v21 = vadd.f32 %v334_v19, %v333_v17 }
 0x1ca   :  { %v346_v22 = vadd.f32 %v345_v20, %v335_v21 }
 0x1cc   :  { %347 = vst [vmem:[#allocation3] sm:$0x1] %v346_v22 }
 0x1cd   :  { %450 = shalt.err (!%p447_p4)
}
 0x1ce   :  { %357 = dma.vmem_to_hbm [thread:$0]  %s355_s16, 16, %s604_s7, [#allocation4]  }
 0x1cf   :  { %459 = dma.done.wait [#allocation4], 16  }
 0x1d0   :  { %460 = vsyncadd [#allocation4], 4294967280 }
 0x1d1   :  { %361 = vsyncpa [#allocation4], 1 }

</bundles_post_ra>
